<compile_context>
chip_gen: v7x
topology: tpu7x:2x2x1
jax: 0.10.0
libtpu: 0.0.40
codegen_flags: <defaults>
</compile_context>

<pallas_src>
import functools

import jax
import jax.numpy as jnp
from jax import lax
from jax.experimental import pallas as pl
from jax.experimental.pallas import tpu as pltpu


_LANE = 128
_SUBLANE = 8
# Leading pass-1 grid axis.  "parallel" -> megacore shards it on v7x (2 TCs);
# on v5e/v6e (1 TC) it is just a 2-iteration outer loop with per-slice partials.
_NUM_M_SPLITS = 2


def _round_up(x: int, m: int) -> int:
    return (x + m - 1) // m * m


def _cdiv(a: int, b: int) -> int:
    return -(-a // b)


# ----------------------------- Pass 1 kernel ---------------------------------
def _conv_stats_kernel(patches_ref, w_ref, sum_ref, sq_ref, *, apply_relu: bool):
    i = pl.program_id(1)

    @pl.when(i == 0)
    def _init():
        sum_ref[...] = jnp.zeros_like(sum_ref)
        sq_ref[...] = jnp.zeros_like(sq_ref)

    # Convolution for this M tile: bf16 operands, f32 accumulation on the MXU.
    y = jnp.dot(patches_ref[...], w_ref[...], preferred_element_type=jnp.float32)
    if apply_relu:
        y = jnp.maximum(y, 0.0)

    # Per-channel partial sums on the VPU (VALU slots are idle while the MXU
    # pushes run): fold the tm rows into 8 sublane groups and accumulate into
    # the resident (8, Cpad) output block.  The final 8-row reduction happens in
    # the tiny XLA epilogue.  No f32 MXU matmuls for statistics.
    tm, cpad = y.shape
    yg = y.reshape(tm // _SUBLANE, _SUBLANE, cpad)
    sum_ref[...] += jnp.sum(yg, axis=0)
    sq_ref[...] += jnp.sum(yg * yg, axis=0)


# ----------------------------- Pass 2 kernel ---------------------------------
def _conv_bn_kernel(patches_ref, w_ref, sb_ref, o_ref, *, apply_relu: bool):
    # Recompute the conv (identical bf16 operands -> identical values as pass 1)
    # and fuse the BN affine; avoids any f32 y round-trip through HBM.
    y = jnp.dot(patches_ref[...], w_ref[...], preferred_element_type=jnp.float32)
    if apply_relu:
        y = jnp.maximum(y, 0.0)
    o_ref[...] = (y * sb_ref[0:1, :] + sb_ref[1:2, :]).astype(o_ref.dtype)


# ------------------------------- Glue / wrapper ------------------------------
def _im2col_nhwc(x_nhwc, k: int, stride: int, padding: int):
    """Extract conv patches. Returns (M, K*K*Cin) with inner order (kh, kw, cin)."""
    n, h, w, c = x_nhwc.shape
    xp = jnp.pad(x_nhwc, ((0, 0), (padding, padding), (padding, padding), (0, 0)))
    h_out = (h + 2 * padding - k) // stride + 1
    w_out = (w + 2 * padding - k) // stride + 1
    cols = []
    for kh in range(k):
        for kw in range(k):
            patch = xp[:, kh:kh + stride * h_out:stride,
                          kw:kw + stride * w_out:stride, :]   # (N, Hout, Wout, Cin)
            cols.append(patch)
    patches = jnp.stack(cols, axis=-2)                        # (N, Hout, Wout, K*K, Cin)
    return patches.reshape(n * h_out * w_out, k * k * c), h_out, w_out


def _vmem_plan():
    """(per-tile budget, vmem_limit_bytes), generation aware."""
    cap = None
    try:
        cap = getattr(pltpu.get_tpu_info(), "vmem_capacity_bytes", None)
    except Exception:
        cap = None
    if cap is None:
        cap = 64 << 20                      # assume the smallest (v7x-sized) VMEM
    if cap >= (100 << 20):                  # v5e / v6e: 128 MiB per TensorCore
        return 64 << 20, 104 << 20
    return 26 << 20, 48 << 20               # v7x: 64 MiB per TensorCore


def _choose_tiling(kkc_pad, c_pad, m_rows, requested_block_m, out_bytes, budget):
    """Return (tm, total_tiles) with balanced tiles (minimal M padding)."""
    if requested_block_m is not None:
        tm_max = max(_LANE, (int(requested_block_m) // _LANE) * _LANE)
    else:
        # Fixed residents: double-buffered bf16 weight + compiler-scratch headroom.
        fixed = kkc_pad * c_pad * 2 * 2 + (1 << 20)
        # Per row: double-buffered bf16 patches + f32 y and y*y temporaries
        #          + double-buffered pass-2 output tile.
        per_row = kkc_pad * 2 * 2 + c_pad * 4 * 2 + c_pad * out_bytes * 2
        tm_max = max(budget - fixed, per_row * _LANE) // per_row
        tm_max = max(_LANE, min(2048, (tm_max // _LANE) * _LANE))
    total_tiles = max(_NUM_M_SPLITS, _cdiv(m_rows, tm_max))
    total_tiles = _round_up(total_tiles, _NUM_M_SPLITS)
    tm = _round_up(max(1, _cdiv(m_rows, total_tiles)), _LANE)
    return tm, total_tiles


def batch_norm_conv2d(x_nchw, weight_oihw, gamma, beta, *,
                      stride: int, padding: int, activation=None,
                      eps: float = 1e-5, block_m=None, out_dtype=jnp.float32):
    """Forward pass of BatchNormConv2d. x_nchw: (N, Cin, H, W); weight: (Cout, Cin, K, K)."""
    n, cin, h, w = x_nchw.shape
    cout, cin_w, k, _ = weight_oihw.shape
    assert cin == cin_w

    x_nhwc = jnp.transpose(x_nchw, (0, 2, 3, 1))
    patches, h_out, w_out = _im2col_nhwc(x_nhwc, k, stride, padding)   # (M, K*K*Cin)
    m_rows = n * h_out * w_out
    kkc = k * k * cin

    # Lane/tile-friendly padding + balanced M tiling.
    kkc_pad = _round_up(kkc, _LANE)
    c_pad = _round_up(cout, _LANE)
    out_bytes = jnp.dtype(out_dtype).itemsize
    budget, vmem_limit = _vmem_plan()
    tm, total_tiles = _choose_tiling(kkc_pad, c_pad, m_rows, block_m, out_bytes, budget)
    m_pad = total_tiles * tm
    tiles_per_split = total_tiles // _NUM_M_SPLITS

    patches_p = jnp.pad(patches.astype(jnp.bfloat16),
                        ((0, m_pad - m_rows), (0, kkc_pad - kkc)))
    # (Cout, Cin, K, K) -> (K, K, Cin, Cout) -> (K*K*Cin, Cout), matching patch order.
    w_mat = jnp.transpose(weight_oihw, (2, 3, 1, 0)).reshape(kkc, cout)
    w_p = jnp.pad(w_mat.astype(jnp.bfloat16),
                  ((0, kkc_pad - kkc), (0, c_pad - cout)))

    apply_relu = activation == "relu"

    # ---- Pass 1: conv matmul + per-channel partial sums (stats only) --------
    kernel1 = functools.partial(_conv_stats_kernel, apply_relu=apply_relu)
    sum_parts, sq_parts = pl.pallas_call(
        kernel1,
        out_shape=(
            jax.ShapeDtypeStruct((_NUM_M_SPLITS * _SUBLANE, c_pad), jnp.float32),
            jax.ShapeDtypeStruct((_NUM_M_SPLITS * _SUBLANE, c_pad), jnp.float32),
        ),
        grid_spec=pltpu.PrefetchScalarGridSpec(
            num_scalar_prefetch=0,
            grid=(_NUM_M_SPLITS, tiles_per_split),
            in_specs=[
                pl.BlockSpec((tm, kkc_pad),
                             lambda c, i: (c * tiles_per_split + i, 0)),
                pl.BlockSpec((kkc_pad, c_pad), lambda c, i: (0, 0)),
            ],
            out_specs=[
                pl.BlockSpec((_SUBLANE, c_pad), lambda c, i: (c, 0)),
                pl.BlockSpec((_SUBLANE, c_pad), lambda c, i: (c, 0)),
            ],
        ),
        compiler_params=pltpu.CompilerParams(
            dimension_semantics=("parallel", "arbitrary"),
            vmem_limit_bytes=vmem_limit),
    )(patches_p, w_p)

    # ---- Tiny XLA epilogue: combine partials, fold BN affine into (scale, bias).
    inv_m = jnp.float32(1.0 / m_rows)
    total = jnp.sum(sum_parts, axis=0)                 # (Cpad,)
    total_sq = jnp.sum(sq_parts, axis=0)
    mean = total * inv_m
    var = jnp.maximum(total_sq * inv_m - mean * mean, 0.0)   # biased variance
    inv_std = lax.rsqrt(var + jnp.float32(eps))
    gamma_p = jnp.pad(gamma.astype(jnp.float32).reshape(-1), (0, c_pad - cout))
    beta_p = jnp.pad(beta.astype(jnp.float32).reshape(-1), (0, c_pad - cout))
    scale = gamma_p * inv_std
    bias = beta_p - mean * scale
    scale_bias = jnp.stack([scale, bias], axis=0)      # (2, Cpad) f32

    # ---- Pass 2: fused conv + BN affine, fully parallel over M tiles --------
    kernel2 = functools.partial(_conv_bn_kernel, apply_relu=apply_relu)
    out_pad = pl.pallas_call(
        kernel2,
        out_shape=jax.ShapeDtypeStruct((m_pad, c_pad), out_dtype),
        grid_spec=pltpu.PrefetchScalarGridSpec(
            num_scalar_prefetch=0,
            grid=(total_tiles,),
            in_specs=[
                pl.BlockSpec((tm, kkc_pad), lambda i: (i, 0)),
                pl.BlockSpec((kkc_pad, c_pad), lambda i: (0, 0)),
                pl.BlockSpec((2, c_pad), lambda i: (0, 0)),
            ],
            out_specs=pl.BlockSpec((tm, c_pad), lambda i: (i, 0)),
        ),
        compiler_params=pltpu.CompilerParams(
            dimension_semantics=("parallel",),
            vmem_limit_bytes=vmem_limit),
    )(patches_p, w_p, scale_bias)

    # Strip padding, (M, Cout) -> (N, Hout, Wout, Cout) -> NCHW.
    out_nhwc = out_pad[:m_rows, :cout].reshape(n, h_out, w_out, cout)
    return jnp.transpose(out_nhwc, (0, 3, 1, 2)).astype(jnp.float32)


# ------------------------------- Reference -----------------------------------
def _reference(x_nchw, weight_oihw, gamma, beta, *, stride, padding, activation, eps=1e-5):
    # Match the kernel's bf16 MXU operands: round inputs to bf16, accumulate in f32.
    xb = x_nchw.astype(jnp.bfloat16).astype(jnp.float32)
    wb = weight_oihw.astype(jnp.bfloat16).astype(jnp.float32)
    y = lax.conv_general_dilated(
        xb, wb,
        window_strides=(stride, stride),
        padding=((padding, padding), (padding, padding)),
        dimension_numbers=("NCHW", "OIHW", "NCHW"))
    if activation == "relu":
        y = jnp.maximum(y, 0.0)
    mean = jnp.mean(y, axis=(0, 2, 3), keepdims=True)
    var = jnp.mean((y - mean) ** 2, axis=(0, 2, 3), keepdims=True)
    y_hat = (y - mean) * lax.rsqrt(var + eps)
    return y_hat * gamma.reshape(1, -1, 1, 1) + beta.reshape(1, -1, 1, 1)


# --------------------------------- Main ---------------------------------------
if __name__ == "__main__":
    key = jax.random.PRNGKey(0)
    k_x, k_w = jax.random.split(key)

    N, Cin, Cout, H, W = 2, 4, 8, 16, 16
    K, stride, padding = 3, 1, 1

    x = jax.random.normal(k_x, (N, Cin, H, W), dtype=jnp.float32)
    # Deterministic Conv2d weight init (kaiming-uniform-like bound), no bias.
    fan_in = Cin * K * K
    bound = 1.0 / (fan_in ** 0.5)
    weight = jax.random.uniform(k_w, (Cout, Cin, K, K), dtype=jnp.float32,
                                minval=-bound, maxval=bound)
    gamma = jnp.ones((Cout,), dtype=jnp.float32)   # BatchNorm2d default weight
    beta = jnp.zeros((Cout,), dtype=jnp.float32)   # BatchNorm2d default bias

    ok = True
    # block_m=128 forces multiple M tiles per split (exercises cross-tile stat
    # accumulation + cross-split combine); block_m=None exercises the
    # generation-aware VMEM-budget tile heuristic.
    for act, bm in ((None, 128), ("relu", 128), ("relu", None)):
        out = batch_norm_conv2d(x, weight, gamma, beta, stride=stride,
                                padding=padding, activation=act, block_m=bm)
        out = jax.block_until_ready(out)
        ref = _reference(x, weight, gamma, beta, stride=stride,
                         padding=padding, activation=act)
        if not jnp.allclose(out, ref, atol=2e-3, rtol=2e-3):
            ok = False

    print("KERNEL_OK" if ok else "KERNEL_MISMATCH")
</pallas_src>

<mosaic_0001>
module attributes {stable_mosaic.version = 11 : i64} {
  func.func @_conv_stats_kernel(%arg0: i32, %arg1: i32, %arg2: memref<128x128xbf16, #tpu.memory_space<vmem>>, %arg3: memref<128x128xbf16, #tpu.memory_space<vmem>>, %arg4: memref<8x128xf32, #tpu.memory_space<vmem>>, %arg5: memref<8x128xf32, #tpu.memory_space<vmem>>) attributes {dimension_semantics = [#tpu.dimension_semantics<parallel>, #tpu.dimension_semantics<arbitrary>], iteration_bounds = array<i64: 2, 2>, scalar_prefetch = 0 : i64, scratch_operands = 0 : i64, tpu.core_type = #tpu.core_type<tc>, window_params = [{transform_indices = @transform_0, window_bounds = array<i64: 128, 128>}, {pipeline_mode = #tpu.pipeline_mode<synchronous>, transform_indices = @transform_1, window_bounds = array<i64: 128, 128>}, {transform_indices = @transform_2, window_bounds = array<i64: 8, 128>}, {transform_indices = @transform_3, window_bounds = array<i64: 8, 128>}]} {
    %c0_i32 = arith.constant 0 : i32
    %0 = arith.cmpi eq, %arg1, %c0_i32 : i32
    %1 = arith.extui %0 : i1 to i32
    %c0_i32_0 = arith.constant 0 : i32
    %2 = arith.cmpi ne, %1, %c0_i32_0 : i32
    scf.if %2 {
      %cst_14 = arith.constant 0.000000e+00 : f32
      %16 = vector.broadcast %cst_14 : f32 to vector<8x128xf32>
      %c0_15 = arith.constant 0 : index
      %c0_16 = arith.constant 0 : index
      %17 = vector.load %arg4[%c0_15, %c0_16] : memref<8x128xf32, #tpu.memory_space<vmem>>, vector<8x128xf32>
      tpu.vector_store %arg4[%c0_15, %c0_16], %16 {strides = array<i32>} : memref<8x128xf32, #tpu.memory_space<vmem>>, vector<8x128xf32>,
      %cst_17 = arith.constant 0.000000e+00 : f32
      %18 = vector.broadcast %cst_17 : f32 to vector<8x128xf32>
      %c0_18 = arith.constant 0 : index
      %c0_19 = arith.constant 0 : index
      %19 = vector.load %arg5[%c0_18, %c0_19] : memref<8x128xf32, #tpu.memory_space<vmem>>, vector<8x128xf32>
      tpu.vector_store %arg5[%c0_18, %c0_19], %18 {strides = array<i32>} : memref<8x128xf32, #tpu.memory_space<vmem>>, vector<8x128xf32>,
    } else {
    }
    %c0 = arith.constant 0 : index
    %c0_1 = arith.constant 0 : index
    %3 = vector.load %arg2[%c0, %c0_1] : memref<128x128xbf16, #tpu.memory_space<vmem>>, vector<128x128xbf16>
    %c0_2 = arith.constant 0 : index
    %c0_3 = arith.constant 0 : index
    %4 = vector.load %arg3[%c0_2, %c0_3] : memref<128x128xbf16, #tpu.memory_space<vmem>>, vector<128x128xbf16>
    %cst = arith.constant dense<0.000000e+00> : vector<128x128xf32>
    %5 = tpu.matmul %3, %4, %cst {dimension_numbers = #tpu.dot_dimension_numbers<[1], [0], [0], [1], [0, 0, 1, 1], [], []>} : vector<128x128xbf16>, vector<128x128xbf16>, vector<128x128xf32> -> vector<128x128xf32>
    %6 = vector.shape_cast %5 : vector<128x128xf32> to vector<16x8x128xf32>
    %c0_4 = arith.constant 0 : index
    %c0_5 = arith.constant 0 : index
    %7 = vector.load %arg4[%c0_4, %c0_5] : memref<8x128xf32, #tpu.memory_space<vmem>>, vector<8x128xf32>
    %cst_6 = arith.constant dense<0.000000e+00> : vector<8x128xf32>
    %8 = vector.multi_reduction <add>, %6, %cst_6 [0] : vector<16x8x128xf32> to vector<8x128xf32>
    %9 = arith.addf %7, %8 : vector<8x128xf32>
    %c0_7 = arith.constant 0 : index
    %c0_8 = arith.constant 0 : index
    %10 = vector.load %arg4[%c0_7, %c0_8] : memref<8x128xf32, #tpu.memory_space<vmem>>, vector<8x128xf32>
    tpu.vector_store %arg4[%c0_7, %c0_8], %9 {strides = array<i32>} : memref<8x128xf32, #tpu.memory_space<vmem>>, vector<8x128xf32>,
    %c0_9 = arith.constant 0 : index
    %c0_10 = arith.constant 0 : index
    %11 = vector.load %arg5[%c0_9, %c0_10] : memref<8x128xf32, #tpu.memory_space<vmem>>, vector<8x128xf32>
    %12 = arith.mulf %6, %6 : vector<16x8x128xf32>
    %cst_11 = arith.constant dense<0.000000e+00> : vector<8x128xf32>
    %13 = vector.multi_reduction <add>, %12, %cst_11 [0] : vector<16x8x128xf32> to vector<8x128xf32>
    %14 = arith.addf %11, %13 : vector<8x128xf32>
    %c0_12 = arith.constant 0 : index
    %c0_13 = arith.constant 0 : index
    %15 = vector.load %arg5[%c0_12, %c0_13] : memref<8x128xf32, #tpu.memory_space<vmem>>, vector<8x128xf32>
    tpu.vector_store %arg5[%c0_12, %c0_13], %14 {strides = array<i32>} : memref<8x128xf32, #tpu.memory_space<vmem>>, vector<8x128xf32>,
    return
  }
  func.func @transform_0(%arg0: i32, %arg1: i32) -> (i32, i32) {
    %c2_i32 = arith.constant 2 : i32
    %0 = arith.muli %arg0, %c2_i32 : i32
    %1 = arith.addi %0, %arg1 : i32
    %c0_i32 = arith.constant 0 : i32
    %c0_i32_0 = arith.constant 0 : i32
    return %1, %c0_i32 : i32, i32
  }
  func.func @transform_1(%arg0: i32, %arg1: i32) -> (i32, i32) {
    %c0_i32 = arith.constant 0 : i32
    %c0_i32_0 = arith.constant 0 : i32
    %c0_i32_1 = arith.constant 0 : i32
    return %c0_i32, %c0_i32_0 : i32, i32
  }
  func.func @transform_2(%arg0: i32, %arg1: i32) -> (i32, i32) {
    %c0_i32 = arith.constant 0 : i32
    %c0_i32_0 = arith.constant 0 : i32
    return %arg0, %c0_i32 : i32, i32
  }
  func.func @transform_3(%arg0: i32, %arg1: i32) -> (i32, i32) {
    %c0_i32 = arith.constant 0 : i32
    %c0_i32_0 = arith.constant 0 : i32
    return %arg0, %c0_i32 : i32, i32
  }
}

</mosaic_0001>

<bundles_post_ra>
// kernel: tpu_custom_call.1
= control target key start
LH: loop header
LB: loop body
LE: loop exit
PB: predicated region body
PF: predicated region fallthrough
CT: control target
= control target key end

     0   :  { %s1484_s0 = inlined_call_operand.hbm [shape: bf16[512,128], index: 0, kind: input, shape index: {}]   ;;  %s1485_s1 = inlined_call_operand.hbm [shape: bf16[128,128], index: 1, kind: input, shape index: {}]   ;;  %s1486_s2 = inlined_call_operand.hbm [shape: f32[16,128], index: 2, kind: output, shape index: {0}]   ;;  %s1487_s3 = inlined_call_operand.hbm [shape: f32[16,128], index: 3, kind: output, shape index: {1}]  }
   0x1   :  { %1502 = sst [smem:[#allocation19_spill]] %s1485_s1 }
   0x2   :  { %1503 = sst [smem:[#allocation20_spill]] %s1486_s2 }
   0x3   :  { %1504 = sst [smem:[#allocation21_spill]] %s1487_s3 }
   0x4   :  { %9 = vsyncpa [#allocation3], 0 }
   0x5   :  { %11 = vsyncpa [#allocation3 + $0x1], 0 }
   0x6   :  { %12 = vsyncpa [#allocation6], 0 }
   0x7   :  { %13 = vsyncpa [#allocation4], 0 }
   0x8   :  { %15 = vsyncpa [#allocation4 + $0x1], 0 }
   0x9   :  { %16 = vsyncpa [#allocation9], 0 }
   0xa   :  { %18 = vsyncpa [#allocation9 + $0x1], 0  ;;  %s1163_s12 = smov 0   ;;  %s1165_s13 = smov 0  }
   0xb   :  { %s1167_s14 = smov 0   ;;  %s1169_s15 = smov 0  }
   0xc   :  { %s1171_s16 = smov 0   ;;  %s1173_s17 = smov 0  }
   0xd   :  { %s1175_s18 = smov 0   ;;  %s1177_s19 = smov 0  }
   0xe   :  { %s1179_s20 = smov 0   ;;  %s1181_s21 = smov 0  }
   0xf   :  { %s1183_s22 = smov 0  }
  0x10 LB: > { %1505 = sst [smem:[#allocation14_spill]] %s1094_s12  ;;  %s677_s23 = sadd.s32 4294967295, %s1134_s22   ;;  %s1134_s22 = sphi %s1183_s22, %s24_s22   ;;  %s1130_s21 = sphi %s1181_s21, %s1541_s21   ;;  %s1126_s20 = sphi %s1179_s20, %s1540_s20   ;;  %s1122_s19 = sphi %s1177_s19, %s1539_s19   ;;  %s1118_s18 = sphi %s1175_s18, %s1532_s18   ;;  %s1114_s17 = sphi %s1173_s17, %s1538_s17   ;;  %s1110_s16 = sphi %s1171_s16, %s1537_s16   ;;  %s1106_s15 = sphi %s1169_s15, %s1536_s15   ;;  %s1102_s14 = sphi %s1167_s14, %s1535_s14   ;;  %s1098_s13 = sphi %s1165_s13, %s1534_s13   ;;  %s1094_s12 = sphi %s1163_s12, %s1533_s12  }
  0x11   : > { %1506 = sst [smem:[#allocation15_spill]] %s1122_s19  ;;  %s678_s24 = sadd.s32 4294967294, %s1134_s22  }
  0x12   : > { %1507 = sst [smem:[#allocation16_spill]] %s1126_s20  ;;  %p60_p0 = scmp.ne.s32.totalorder %s1110_s16, %s1106_s15 }
  0x13   : > { %p1219_p1 = scmp.eq.s32.totalorder %s677_s23, 0  ;;  %p104_p2 = scmp.ne.s32.totalorder %s1102_s14, %s1098_s13 }
  0x14   : > { %p105_p4 = scmp.eq.s32.totalorder %s677_s23, 3  ;;  %p110_p5 = scmp.ne.s32.totalorder %s1098_s13, %s1094_s12 }
  0x15   : > { %s1508_s25 = scalar_select %p1219_p1, 1, 0 }
  0x16   : > { %p1227_p3 = por %p1219_p1, %p60_p0  ;;  %p111_p6 = scmp.eq.s32.totalorder %s678_s24, 3 }
  0x17   : > { %p1233_p7 = por %p105_p4, %p104_p2  ;;  %p681_p8 = scmp.ge.s32.totalorder %s1134_s22, 1 }
  0x18   : > { %s1509_s26 = scalar_select %p1227_p3, 1, 0 }
  0x19   : > { %s1510_s27 = scalar_select %p1233_p7, 1, 0 }
  0x1a   : > { %p1238_p9 = por %p111_p6, %p110_p5  ;;  %p144_p10 = scmp.lt.s32.totalorder %s1134_s22, 5 }
  0x1b   : > { %1511 = sst [smem:[#allocation17_spill]] %s1510_s27  ;;  %s1136_s30 = smov [#allocation5]  }
  0x1c   : > { %s1512_s28 = scalar_select %p1238_p9, 1, 0 }
  0x1d   : > { %p1243_p11 = pnand %p681_p8, %p144_p10  ;;  %s156_s4 = sshll.u32 %s1136_s30, 4  ;;  %s157_s4 = int_to_ptr.vmem [resolvable:$true] %s156_s4 }
  0x1e   : > { %1513 = sst [smem:[#allocation18_spill]] %s1512_s28  ;;  %s1516_s1 = sld [smem:[#allocation19_spill]] }
  0x1f   : > { %s1514_s29 = scalar_select %p1243_p11, 1, 0 }
  0x20   : > { %p791_p12 = pneg %p1243_p11 }
  0x22   : > { %p1251_p13 = pnand %p791_p12, %p1219_p1 }
  0x24   : > { %s918_s8 = scalar_lea.hbm %s1516_s1, 1024  ;;  %p920_p2 = pneg %p1251_p13 }
  0x25   : > { %p919_p0 = scmp.ne.s32.totalorder %s1516_s1, %s918_s8  ;;  %p925_p6 = scmp.lt.u32.totalorder %s918_s8, %s1516_s1 }
  0x27   : > { %p921_p4 = pnand %p920_p2, %p919_p0 }
  0x29   : > { %p922_p5 = pneg %p921_p4 }
  0x2b   : > { %p927_p8 = pnand %p925_p6, %p922_p5 }
  0x2d   : > { %930 = shalt.err (!%p927_p8)
}
  0x2e   : > { %s931_s23 = scalar_lea.vmem %s157_s4, 1024  ;;  %p939_p7 = scmp.lt.s32.totalorder %s157_s4, %s157_s4 }
  0x2f   : > { %p932_p10 = scmp.ne.s32.totalorder %s157_s4, %s931_s23  ;;  %p940_p1 = scmp.lt.s32.totalorder %s931_s23, %s931_s23 }
  0x31   : > { %p934_p12 = pnand %p932_p10, %p920_p2  ;;  %p941_p3 = por %p940_p1, %p939_p7 }
  0x33   : > { %p935_p9 = pneg %p934_p12 }
  0x35   : > { %p942_p11 = pnand %p941_p3, %p935_p9 }
  0x37   : > { %945 = shalt.err (!%p942_p11)
}
  0x38   : > { %s1493_s24 = smov 64   ;;  %s1494_s30 = smov 4  }
  0x39   : > { %794 = dma.hbm_to_vmem [thread:$0]  (!%p1251_p13), %s1516_s1, 1024, %s157_s4, [#allocation6], %s1493_s24, %s1493_s24, %s1494_s30  }
  0x3a   : > { %s94_s8 = sadd.s32 1, %s1102_s14  ;;  %s33_s9 = sadd.s32 1, %s1126_s20 }
  0x3b   : > { %p34_p1 = scmp.ge.s32.totalorder %s33_s9, 2  ;;  %s36_s10 = sadd.s32 1, %s1130_s21 }
  0x3c   : > { %s679_s11 = sshll.u32 %s1130_s21, 1  ;;  %s47_s15 = sadd.s32 1, %s1114_s17 }
  0x3d   : > { %s1543_s9 = smov (%p34_p1, %s33_s9), 0  ;;  %s1545_s10 = smov (!%p34_p1, %s36_s10), %s1130_s21 }
  0x3e   : > { %p54_p3 = scmp.ne.s32.totalorder %s1114_s17, %s1110_s16  ;;  %p38_p7 = scmp.ge.s32.totalorder %s1545_s10, 2 }
  0x3f   : > { %p55_p9 = scmp.eq.s32.totalorder %s1134_s22, 0  ;;  %s41_s5 = sadd.s32 %s1126_s20, %s679_s11 }
  0x40   : > { %p807_p11 = scmp.lt.s32.totalorder %s1134_s22, 4  ;;  %s1547_s10 = smov (%p38_p7, %s1545_s10), 0 }
  0x41   : > { %p1289_p13 = por %p55_p9, %p54_p3  ;;  %s170_s23 = sand.u32 1, %s1114_s17  }
  0x42   : > { %s680_s6 = sshll.u32 %s1547_s10, 1  ;;  %s91_s7 = ssub.s32 %s1130_s21, %s1547_s10 }
  0x43   : > { %s43_s24 = sadd.s32 %s680_s6, %s1543_s9  ;;  %p92_p0 = scmp.eq.s32.totalorder %s91_s7, 0 }
  0x44   : > { %s44_s30 = ssub.s32 %s41_s5, %s43_s24  ;;  %s684_s1 = sshll.u32 %s170_s23, 6 }
  0x45   : > { %p45_p2 = scmp.eq.s32.totalorder %s44_s30, 0  ;;  %s716_s28 = sshll.u32 %s41_s5, 10 }
  0x46   : > { %s1299_s11 = scalar_select %p92_p0, %s1102_s14, %s94_s8  }
  0x47   : > { %s1302_s20 = scalar_select %p45_p2, %s1114_s17, %s47_s15  }
  0x48   : > { %s174_s12 = scalar_lea.vmem [#allocation2], %s684_s1  ;;  %s1307_s19 = scalar_lea.hbm %s1484_s0, %s716_s28 }
  0x49   : > { %s183_s3 = sshll.u32 %s174_s12, 4  ;;  %p1315_p4 = pnand %p807_p11, %p1289_p13  ;;  %s1309_s3 = int_to_ptr.vmem [resolvable:$true] %s183_s3 }
  0x4a   : > { %s1319_s1 = scalar_lea.sflag [#allocation3], %s170_s23  ;;  %s946_s12 = scalar_lea.hbm %s1307_s19, 1024 }
  0x4b   : > { %p947_p5 = scmp.ne.s32.totalorder %s1307_s19, %s946_s12  ;;  %p948_p6 = pneg %p1315_p4 }
  0x4c   : > { %s951_s28 = scalar_lea.hbm %s1484_s0, 4096  ;;  %p952_p12 = scmp.lt.u32.totalorder %s1307_s19, %s1484_s0 }
  0x4d   : > { %p949_p8 = pnand %p948_p6, %p947_p5  ;;  %p953_p1 = scmp.lt.u32.totalorder %s951_s28, %s946_s12 }
  0x4e   : > { %p955_p7 = scmp.lt.u32.totalorder %s946_s12, %s1307_s19 }
  0x4f   : > { %p950_p10 = pneg %p949_p8  ;;  %p954_p3 = por %p953_p1, %p952_p12 }
  0x51   : > { %p956_p9 = por %p955_p7, %p954_p3 }
  0x53   : > { %p957_p11 = pnand %p956_p9, %p950_p10 }
  0x55   : > { %960 = shalt.err (!%p957_p11)
}
  0x56   : > { %s961_s15 = scalar_lea.vmem %s1309_s3, 1024  ;;  %s1139_s5 = smov [#allocation2]  }
  0x57   : > { %p962_p13 = scmp.ne.s32.totalorder %s1309_s3, %s961_s15  ;;  %s966_s4 = sshll.u32 %s1139_s5, 4  ;;  %s967_s4 = int_to_ptr.vmem [resolvable:$false] %s966_s4 }
  0x58   : > { %s968_s23 = scalar_lea.vmem %s967_s4, 2048  ;;  %p969_p5 = scmp.lt.s32.totalorder %s1309_s3, %s967_s4 }
  0x59   : > { %p964_p0 = pnand %p962_p13, %p948_p6  ;;  %p970_p8 = scmp.lt.s32.totalorder %s968_s23, %s961_s15 }
  0x5b   : > { %p965_p2 = pneg %p964_p0  ;;  %p971_p12 = por %p970_p8, %p969_p5 }
  0x5d   : > { %p972_p1 = pnand %p971_p12, %p965_p2 }
  0x5f   : > { %975 = shalt.err (!%p972_p1)
}
  0x60   : > { %s1519_s6 = smov 4   ;;  %s1520_s7 = smov 64  }
  0x61   : > { %798 = dma.hbm_to_vmem [thread:$0]  (!%p1315_p4), %s1307_s19, 1024, %s1309_s3, %s1319_s1, %s1520_s7, %s1520_s7, %s1519_s6  }
  0x62   : > { %p1521_p6 = scmp.ne.s32.totalorder %s1514_s29, 0 }
  0x63   : > { %s197_s12 = sand.u32 (!%p1521_p6), 1, %s1110_s16   ;;  %p1522_p10 = scmp.ne.s32.totalorder (!%p1521_p6), %s1509_s26, 0 }
  0x64   : > { %195 = sbr.rel (%p1521_p6) target bundleno = 438 (0x1b6), region = 28  ;;  %s689_s2 = sshll.u32 (!%p1521_p6), %s197_s12, 6 }
  0x65   : > { %s198_s27 = scalar_lea.sflag (!%p1521_p6), [#allocation3], %s197_s12  ;;  %s1353_s28 = scalar_lea.vmem (!%p1521_p6), [#allocation2], %s689_s2 }
  0x6b   : > { %1077 = dma.done.wait (%p1522_p10), %s198_s27, 1024  }
  0x6c   : > { %1079 = vsyncadd (%p1522_p10), %s198_s27, 4294966272  ;;  %p1523_p3 = scmp.ne.s32.totalorder %s1508_s25, 0 }
  0x6e   : > { %1081 = dma.done.wait (%p1523_p3), [#allocation6], 1024  }
  0x6f   : > { %1083 = vsyncadd (%p1523_p3), [#allocation6], 4294966272  ;;  %s1364_s3 = sand.u32 1, %s1098_s13   ;;  %p693_p4 = scmp.ne.s32.totalorder %s1118_s18, 0 }
  0x70   : > { %s691_s19 = sshll.u32 %s1364_s3, 3  ;;  %v1140_v0 = vmov (!%p693_p4), 0.0  }
  0x71   : > { %s1367_s29 = scalar_lea.vmem [#allocation7], %s691_s19  ;;  %s1369_s24 = scalar_lea.vmem [#allocation8], %s691_s19 }
  0x72   : > { %240 = sbr.rel (%p693_p4) target bundleno = 121 (0x79), region = 40  ;;  %241 = vst [vmem:[%s1367_s29] sm:$0xff] (!%p693_p4), %v1140_v0  ;;  %242 = vst [vmem:[%s1369_s24] sm:$0xff] (!%p693_p4), %v1140_v0 }
  0x79 PF: > { %v902_v1 = vld [vmem:[#allocation5] sm:$0xff]   ;;  %v903_v2 = vld [vmem:[#allocation5 + $0x8] sm:$0xff]   ;;  %v904_v3 = vld [vmem:[#allocation5 + $0x10] sm:$0xff]   ;;  %s1524_s18 = sld [smem:[#allocation15_spill]]  ;;  %s539_s26 = sshll.u32 %s1367_s29, 4  ;;  %s1392_s26 = int_to_ptr.vmem [resolvable:$true] %s539_s26 }
  0x7a   : > { %733 = vmatprep.subr.bf16.mxu0 %v902_v1  ;;  %765 = vmatprep.subr.bf16.mxu1 %v902_v1  ;;  %v905_v4 = vld [vmem:[#allocation5 + $0x18] sm:$0xff]   ;;  %v910_v5 = vld [vmem:[%s1353_s28] sm:$0xff]   ;;  %v907_v8 = vld [vmem:[#allocation5 + $0x28] sm:$0xff]   ;;  %s1525_s1 = sld [smem:[#allocation17_spill]]  ;;  %s552_s30 = sshll.u32 %s1369_s24, 4  ;;  %s1400_s30 = int_to_ptr.vmem [resolvable:$true] %s552_s30 }
  0x7b   : > { %734 = vmatpush3.bf16.msra.mxu0 %v902_v1  ;;  %773 = vmatpush3.bf16.msra.mxu1 %v902_v1  ;;  %v906_v6 = vld [vmem:[#allocation5 + $0x20] sm:$0xff]   ;;  %v908_v9 = vld [vmem:[#allocation5 + $0x30] sm:$0xff]   ;;  %v909_v10 = vld [vmem:[#allocation5 + $0x38] sm:$0xff]   ;;  %s1526_s5 = sld [smem:[#allocation20_spill]]  ;;  %s1527_s7 = sld [smem:[#allocation21_spill]] }
  0x7c   : > { %735 = vmatprep.subr.bf16.mxu0 %v903_v2  ;;  %766 = vmatprep.subr.bf16.mxu1 %v903_v2  ;;  %v914_v7 = vld [vmem:[%s1353_s28 + $0x20] sm:$0xff]   ;;  %v911_v11 = vld [vmem:[%s1353_s28 + $0x8] sm:$0xff]   ;;  %v912_v13 = vld [vmem:[%s1353_s28 + $0x10] sm:$0xff]   ;;  %s521_s2 = scalar_lea.sflag [#allocation4], %s1364_s3  ;;  %s976_s27 = scalar_lea.vmem %s1392_s26, 128 }
  0x7d   : > { %749 = vmatprep.mubr.bf16.mxu0 %v910_v5  ;;  %757 = vmatprep.mubr.bf16.mxu1 %v914_v7  ;;  %v915_v12 = vld [vmem:[%s1353_s28 + $0x28] sm:$0xff]   ;;  %v916_v14 = vld [vmem:[%s1353_s28 + $0x30] sm:$0xff]   ;;  %v913_v15 = vld [vmem:[%s1353_s28 + $0x18] sm:$0xff]   ;;  %p977_p7 = scmp.ne.s32.totalorder %s1392_s26, %s976_s27 }
  0x7e   : > { %v917_v16 = vld [vmem:[%s1353_s28 + $0x38] sm:$0xff]   ;;  %s1141_s28 = smov [#allocation7]  }
  0x7f   : > { %736 = vmatpush3.bf16.msra.mxu0 %v903_v2  ;;  %774 = vmatpush3.bf16.msra.mxu1 %v903_v2  ;;  %s712_s25 = sshll.u32 %s1524_s18, 7  ;;  %s980_s19 = sshll.u32 %s1141_s28, 4  ;;  %s981_s19 = int_to_ptr.vmem [resolvable:$false] %s980_s19 }
  0x80   : > { %737 = vmatprep.subr.bf16.mxu0 %v904_v3  ;;  %767 = vmatprep.subr.bf16.mxu1 %v904_v3  ;;  %p1528_p9 = scmp.ne.s32.totalorder %s1525_s1, 0  ;;  %s982_s18 = scalar_lea.vmem %s981_s19, 256 }
  0x81   : > { %s1390_s4 = scalar_lea.hbm %s1526_s5, %s712_s25  ;;  %s1398_s12 = scalar_lea.hbm %s1527_s7, %s712_s25 }
  0x82   : > { %p978_p11 = pnand %p977_p7, %p1528_p9  ;;  %p983_p0 = scmp.lt.s32.totalorder %s1392_s26, %s981_s19 }
  0x83   : > { %738 = vmatpush3.bf16.msra.mxu0 %v904_v3  ;;  %775 = vmatpush3.bf16.msra.mxu1 %v904_v3  ;;  %p984_p2 = scmp.lt.s32.totalorder %s982_s18, %s976_s27 }
  0x84   : > { %739 = vmatprep.subr.bf16.mxu0 %v905_v4  ;;  %768 = vmatprep.subr.bf16.mxu1 %v905_v4  ;;  %p979_p13 = pneg %p978_p11 }
  0x85   : > { %p985_p5 = por %p984_p2, %p983_p0 }
  0x87   : > { %740 = vmatpush3.bf16.msra.mxu0 %v905_v4  ;;  %776 = vmatpush3.bf16.msra.mxu1 %v905_v4  ;;  %p986_p8 = pnand %p985_p5, %p979_p13 }
  0x88   : > { %741 = vmatprep.subr.bf16.mxu0 %v906_v6  ;;  %769 = vmatprep.subr.bf16.mxu1 %v906_v6 }
  0x8b   : > { %742 = vmatpush3.bf16.msra.mxu0 %v906_v6  ;;  %777 = vmatpush3.bf16.msra.mxu1 %v906_v6 }
  0x8c   : > { %743 = vmatprep.subr.bf16.mxu0 %v907_v8  ;;  %770 = vmatprep.subr.bf16.mxu1 %v907_v8 }
  0x8f   : > { %744 = vmatpush3.bf16.msra.mxu0 %v907_v8  ;;  %778 = vmatpush3.bf16.msra.mxu1 %v907_v8 }
  0x90   : > { %745 = vmatprep.subr.bf16.mxu0 %v908_v9  ;;  %771 = vmatprep.subr.bf16.mxu1 %v908_v9 }
  0x93   : > { %746 = vmatpush3.bf16.msra.mxu0 %v908_v9  ;;  %779 = vmatpush3.bf16.msra.mxu1 %v908_v9 }
  0x94   : > { %747 = vmatprep.subr.bf16.mxu0 %v909_v10  ;;  %772 = vmatprep.subr.bf16.mxu1 %v909_v10 }
  0x97   : > { %748 = vmatpush3.bf16.msra.mxu0 %v909_v10  ;;  %780 = vmatpush3.bf16.msra.mxu1 %v909_v10 }
  0x9a   : > { %750 = vmatmul.mubr.bf16.vlgmr.msra.gmra.mrb[0].mxu0 %v911_v11  ;;  %758 = vmatmul.mubr.bf16.vlgmr.msra.gmra.mrb[0].mxu1 %v915_v12  ;;  %v468_v11 = vld [vmem:[%s1367_s29] sm:$0xff] }
  0x9b   : > { %753 = vmatprep.mubr.bf16.mxu0 %v912_v13  ;;  %761 = vmatprep.mubr.bf16.mxu1 %v916_v14 }
  0xa2   : > { %754 = vmatmul.mubr.bf16.gmra.mrb[4].mxu0 %v913_v15  ;;  %762 = vmatmul.mubr.bf16.gmra.mrb[4].mxu1 %v917_v16  ;;  %v486_v15 = vld [vmem:[%s1369_s24] sm:$0xff] }
 0x16d   : > { %v751_v17 = vpop.f32.mrb[0].mxu0  ;;  %v759_v18 = vpop.f32.mrb[0].mxu1 }
 0x16e   : > { %v405_v19 = vpop.f32.mrb[1].mxu0  ;;  %v437_v20 = vpop.f32.mrb[1].mxu1  ;;  %v489_v28 = vmul.f32 %v751_v17, %v751_v17  ;;  %v497_v60 = vmul.f32 %v759_v18, %v759_v18 }
 0x16f   : > { %v752_v21 = vpop.f32.mrb[2].mxu0  ;;  %v760_v22 = vpop.f32.mrb[2].mxu1  ;;  %v487_v25 = vmul.f32 %v405_v19, %v405_v19  ;;  %v495_v54 = vmul.f32 %v437_v20, %v437_v20 }
 0x170   : > { %v408_v23 = vpop.f32.mrb[3].mxu0  ;;  %v440_v24 = vpop.f32.mrb[3].mxu1  ;;  %v490_v31 = vmul.f32 %v752_v21, %v752_v21  ;;  %v498_v63 = vmul.f32 %v760_v22, %v760_v22 }
 0x171   : > { %v469_v26 = vadd.f32 %v408_v23, %v405_v19  ;;  %v488_v27 = vmul.f32 %v408_v23, %v408_v23  ;;  %v496_v59 = vmul.f32 %v440_v24, %v440_v24 }
 0x173   : > { %v470_v29 = vadd.f32 %v751_v17, %v469_v26  ;;  %v503_v30 = vadd.f32 %v488_v27, %v487_v25 }
 0x175   : > { %v504_v32 = vadd.f32 %v503_v30, %v489_v28  ;;  %v755_v33 = vpop.f32.mrb[4].mxu0  ;;  %v471_v34 = vadd.f32 %v752_v21, %v470_v29  ;;  %v763_v35 = vpop.f32.mrb[4].mxu1 }
 0x176   : > { %v421_v36 = vpop.f32.mrb[5].mxu0  ;;  %v453_v37 = vpop.f32.mrb[5].mxu1  ;;  %v493_v48 = vmul.f32 %v755_v33, %v755_v33  ;;  %v501_v8 = vmul.f32 %v763_v35, %v763_v35 }
 0x177   : > { %v472_v38 = vadd.f32 %v471_v34, %v421_v36  ;;  %v491_v39 = vmul.f32 %v421_v36, %v421_v36  ;;  %v505_v40 = vadd.f32 %v504_v32, %v490_v31  ;;  %v756_v41 = vpop.f32.mrb[6].mxu0  ;;  %v764_v42 = vpop.f32.mrb[6].mxu1  ;;  %v499_v2 = vmul.f32 %v453_v37, %v453_v37 }
 0x178   : > { %v424_v43 = vpop.f32.mrb[7].mxu0  ;;  %v456_v44 = vpop.f32.mrb[7].mxu1  ;;  %v494_v51 = vmul.f32 %v756_v41, %v756_v41  ;;  %v502_v12 = vmul.f32 %v764_v42, %v764_v42 }
 0x179   : > { %v506_v45 = vadd.f32 %v505_v40, %v491_v39  ;;  %v473_v46 = vadd.f32 %v472_v38, %v424_v43  ;;  %v492_v47 = vmul.f32 %v424_v43, %v424_v43  ;;  %v500_v7 = vmul.f32 %v456_v44, %v456_v44 }
 0x17b   : > { %v474_v49 = vadd.f32 %v755_v33, %v473_v46  ;;  %v507_v50 = vadd.f32 %v506_v45, %v492_v47 }
 0x17d   : > { %v508_v52 = vadd.f32 %v507_v50, %v493_v48  ;;  %v475_v53 = vadd.f32 %v756_v41, %v474_v49 }
 0x17f   : > { %v476_v55 = vadd.f32 %v475_v53, %v437_v20  ;;  %v509_v56 = vadd.f32 %v508_v52, %v494_v51 }
 0x181   : > { %v510_v57 = vadd.f32 %v509_v56, %v495_v54  ;;  %v477_v58 = vadd.f32 %v476_v55, %v440_v24 }
 0x183   : > { %v478_v61 = vadd.f32 %v759_v18, %v477_v58  ;;  %v511_v62 = vadd.f32 %v510_v57, %v496_v59 }
 0x185   : > { %v512_v0 = vadd.f32 %v511_v62, %v497_v60  ;;  %v479_v1 = vadd.f32 %v760_v22, %v478_v61 }
 0x187   : > { %v480_v3 = vadd.f32 %v479_v1, %v453_v37  ;;  %v513_v4 = vadd.f32 %v512_v0, %v498_v63 }
 0x189   : > { %v514_v5 = vadd.f32 %v513_v4, %v499_v2  ;;  %v481_v6 = vadd.f32 %v480_v3, %v456_v44 }
 0x18b   : > { %v482_v9 = vadd.f32 %v763_v35, %v481_v6  ;;  %v515_v10 = vadd.f32 %v514_v5, %v500_v7 }
 0x18d   : > { %v483_v13 = vadd.f32 %v764_v42, %v482_v9  ;;  %v516_v14 = vadd.f32 %v515_v10, %v501_v8 }
 0x18f   : > { %v517_v16 = vadd.f32 %v516_v14, %v502_v12  ;;  %v484_v17 = vadd.f32 %v483_v13, %v468_v11 }
 0x191   : > { %485 = vst [vmem:[%s1367_s29] sm:$0xff] %v484_v17  ;;  %v518_v18 = vadd.f32 %v517_v16, %v486_v15 }
 0x192   : > { %989 = shalt.err (!%p986_p8)
}
 0x193   : > { %s990_s29 = scalar_lea.hbm %s1390_s4, 128  ;;  %s994_s15 = scalar_lea.hbm %s1526_s5, 256 }
 0x194   : > { %p991_p12 = scmp.ne.s32.totalorder %s1390_s4, %s990_s29  ;;  %p995_p10 = scmp.lt.u32.totalorder %s1390_s4, %s1526_s5 }
 0x195   : > { %p996_p3 = scmp.lt.u32.totalorder %s994_s15, %s990_s29  ;;  %p998_p7 = scmp.lt.u32.totalorder %s990_s29, %s1390_s4 }
 0x196   : > { %p992_p1 = pnand %p991_p12, %p1528_p9 }
 0x197   : > { %p997_p4 = por %p996_p3, %p995_p10 }
 0x198   : > { %p993_p6 = pneg %p992_p1 }
 0x199   : > { %p999_p11 = por %p998_p7, %p997_p4 }
 0x19b   : > { %p1000_p13 = pnand %p999_p11, %p993_p6 }
 0x19d   : > { %1003 = shalt.err (!%p1000_p13)
}
 0x19e   : > { %787 = dma.vmem_to_hbm [thread:$0]  (%p1528_p9), %s1392_s26, 128, %s1390_s4, %s521_s2   ;;  %519 = vst [vmem:[%s1369_s24] sm:$0xff] %v518_v18 }
 0x19f   : > { %s526_s27 = scalar_lea.sflag [#allocation9], %s1364_s3  ;;  %s1004_s28 = scalar_lea.vmem %s1400_s30, 128 }
 0x1a0   : > { %p1005_p0 = scmp.ne.s32.totalorder %s1400_s30, %s1004_s28  ;;  %s1142_s19 = smov [#allocation8]  }
 0x1a1   : > { %s1008_s18 = sshll.u32 %s1142_s19, 4  ;;  %s1009_s18 = int_to_ptr.vmem [resolvable:$false] %s1008_s18 }
 0x1a2   : > { %p1006_p2 = pnand %p1005_p0, %p1528_p9  ;;  %s1010_s29 = scalar_lea.vmem %s1009_s18, 256 }
 0x1a3   : > { %p1011_p8 = scmp.lt.s32.totalorder %s1400_s30, %s1009_s18  ;;  %p1012_p12 = scmp.lt.s32.totalorder %s1010_s29, %s1004_s28 }
 0x1a4   : > { %p1007_p5 = pneg %p1006_p2 }
 0x1a5   : > { %p1013_p1 = por %p1012_p12, %p1011_p8 }
 0x1a7   : > { %p1014_p6 = pnand %p1013_p1, %p1007_p5 }
 0x1a9   : > { %1017 = shalt.err (!%p1014_p6)
}
 0x1aa   : > { %s1018_s3 = scalar_lea.hbm %s1398_s12, 128  ;;  %s1022_s4 = scalar_lea.hbm %s1527_s7, 256 }
 0x1ab   : > { %p1019_p10 = scmp.ne.s32.totalorder %s1398_s12, %s1018_s3  ;;  %p1023_p7 = scmp.lt.u32.totalorder %s1398_s12, %s1527_s7 }
 0x1ac   : > { %p1024_p11 = scmp.lt.u32.totalorder %s1022_s4, %s1018_s3  ;;  %p1026_p0 = scmp.lt.u32.totalorder %s1018_s3, %s1398_s12 }
 0x1ad   : > { %p1020_p3 = pnand %p1019_p10, %p1528_p9 }
 0x1ae   : > { %p1025_p13 = por %p1024_p11, %p1023_p7 }
 0x1af   : > { %p1021_p4 = pneg %p1020_p3 }
 0x1b0   : > { %p1027_p2 = por %p1026_p0, %p1025_p13 }
 0x1b2   : > { %p1028_p5 = pnand %p1027_p2, %p1021_p4 }
 0x1b4   : > { %1031 = shalt.err (!%p1028_p5)
}
 0x1b5   : > { %788 = dma.vmem_to_hbm [thread:$0]  (%p1528_p9), %s1400_s30, 128, %s1398_s12, %s526_s27  }
 0x1b6 PF: > { %s1529_s8 = sld [smem:[#allocation14_spill]]  ;;  %s1530_s15 = sld [smem:[#allocation18_spill]] }
 0x1b7   : > { %p809_p8 = scmp.ge.s32.totalorder %s1134_s22, 2 }
 0x1bc   : > { %s564_s23 = sand.u32 1, %s1529_s8   ;;  %p1531_p12 = scmp.ne.s32.totalorder %s1530_s15, 0 }
 0x1bd   : > { %s565_s6 = scalar_lea.sflag [#allocation4], %s564_s23 }
 0x1be   : > { %p800_p1 = pnand %p809_p8, %p1531_p12 }
 0x1c0   : > { %1085 = dma.done.wait (!%p800_p1), %s565_s6, 128  }
 0x1c1   : > { %1087 = vsyncadd (!%p800_p1), %s565_s6, 4294967168  ;;  %s574_s28 = scalar_lea.sflag [#allocation9], %s564_s23 }
 0x1c2   : > { %1089 = dma.done.wait (!%p800_p1), %s574_s28, 128  }
 0x1c3   : > { %1091 = vsyncadd (!%p800_p1), %s574_s28, 4294967168  ;;  %s24_s22 = sadd.s32 1, %s1134_s22   ;;  %s1532_s18 = sld [smem:[#allocation16_spill]] }
 0x1c4   : > { %p21_p6 = scmp.ge.s32.totalorder %s24_s22, 6   ;;  %s1533_s12 = smov %s1098_s13 }
 0x1c5   : > { %s1534_s13 = smov %s1102_s14  ;;  %s1535_s14 = smov %s1299_s11 }
 0x1c6   : > { %s1536_s15 = smov %s1110_s16  ;;  %s1537_s16 = smov %s1114_s17 }
 0x1c7   : > { %s1538_s17 = smov %s1302_s20  ;;  %s1539_s19 = smov %s1130_s21 }
 0x1c8   : > { %s1540_s20 = smov %s1543_s9  ;;  %s1541_s21 = smov %s1547_s10 }
 0x1c9   :  { %23 = sbr.rel (!%p21_p6) target bundleno = 16 (0x10), region = 98 }
 0x1d0   :  { %579 = vsyncpa [#allocation3], 1 }
 0x1d1   :  { %581 = vsyncpa [#allocation3 + $0x1], 1 }
 0x1d2   :  { %582 = vsyncpa [#allocation6], 1 }
 0x1d3   :  { %583 = vsyncpa [#allocation4], 1 }
 0x1d4   :  { %585 = vsyncpa [#allocation4 + $0x1], 1 }
 0x1d5   :  { %586 = vsyncpa [#allocation9], 1 }
 0x1d6   :  { %588 = vsyncpa [#allocation9 + $0x1], 1 }

</bundles_post_ra>
